<compile_context>
chip_gen: v5e
topology: v5e:2x2
jax: 0.10.0
libtpu: 0.0.40
codegen_flags: <defaults>
</compile_context>

<pallas_src>
import functools

import jax
import jax.numpy as jnp
from jax.experimental import pallas as pl
from jax.experimental.pallas import tpu as pltpu

N_IN = 28 * 28      # 784
N_HID = 20
N_OUT = 10
N_OUT_PAD = 16      # small padded output width (sliced back to 10 in wrapper)


def _round_up(x, m):
    return ((x + m - 1) // m) * m


def mlp_kernel(x_ref, w1_ref, b1_ref, w2_ref, b2_ref,
               w3_ref, b3_ref, w4_ref, b4_ref, o_ref):
    # x_ref: (tile, 784) f32; weights bf16; biases f32; f32 MXU accumulation.
    x = x_ref[...].astype(jnp.bfloat16)

    h = jnp.dot(x, w1_ref[...], preferred_element_type=jnp.float32)
    h = jax.nn.sigmoid(h + b1_ref[...])

    h = jnp.dot(h.astype(jnp.bfloat16), w2_ref[...],
                preferred_element_type=jnp.float32)
    h = jax.nn.sigmoid(h + b2_ref[...])

    h = jnp.dot(h.astype(jnp.bfloat16), w3_ref[...],
                preferred_element_type=jnp.float32)
    h = jax.nn.sigmoid(h + b3_ref[...])

    out = jnp.dot(h.astype(jnp.bfloat16), w4_ref[...],
                  preferred_element_type=jnp.float32) + b4_ref[...]
    o_ref[...] = out.astype(o_ref.dtype)


@functools.partial(jax.jit, static_argnames=("batch_tile",))
def mlp_forward(x, params, *, batch_tile=1024):
    """x: [B, 1, 28, 28] (NCHW) or [B, 784]. Returns [B, 10] (float32)."""
    x2d = x.reshape((-1, N_IN)).astype(jnp.float32)
    B = x2d.shape[0]

    # Divisor-balanced tiling: waste < 8 rows per step; >= 2 (even) steps once
    # the batch is big enough so the pipeline overlaps DMA/compute and the
    # batch axis shards across both v7x TensorCores.
    n_steps = max(1, -(-B // batch_tile))
    if n_steps == 1 and B >= 256:
        n_steps = 2
    if n_steps > 1 and n_steps % 2:
        n_steps += 1
    tile = _round_up(-(-B // n_steps), 8)
    B_pad = tile * n_steps
    grid = (n_steps,)

    # Pad the batch only if needed (zero rows: computed and discarded).
    if B_pad != B:
        x2d = jnp.pad(x2d, ((0, B_pad - B), (0, 0)))

    (w1, b1, w2, b2, w3, b3, w4, b4) = params
    w1b = w1.astype(jnp.bfloat16)
    w2b = w2.astype(jnp.bfloat16)
    w3b = w3.astype(jnp.bfloat16)
    # Pad last layer to 16 output columns; keep its bias f32.
    w4p = jnp.zeros((N_HID, N_OUT_PAD), jnp.float32).at[:, :N_OUT].set(w4)
    w4p = w4p.astype(jnp.bfloat16)
    b4p = jnp.zeros((1, N_OUT_PAD), jnp.float32).at[:, :N_OUT].set(b4)

    full = lambda shape: pl.BlockSpec(shape, lambda i: (0, 0))

    weight_bytes = ((N_IN * N_HID + 2 * N_HID * N_HID + N_HID * N_OUT_PAD) * 2
                    + (3 * N_HID + N_OUT_PAD) * 4)
    cost = pl.CostEstimate(
        flops=2 * B_pad * (N_IN * N_HID + 2 * N_HID * N_HID + N_HID * N_OUT_PAD),
        transcendentals=2 * 3 * B_pad * N_HID,   # exp + recip per sigmoid elem
        bytes_accessed=B_pad * N_IN * 4 + B_pad * N_OUT_PAD * 4 + weight_bytes,
    )

    out = pl.pallas_call(
        mlp_kernel,
        out_shape=jax.ShapeDtypeStruct((B_pad, N_OUT_PAD), jnp.float32),
        grid_spec=pltpu.PrefetchScalarGridSpec(
            num_scalar_prefetch=0,
            grid=grid,
            in_specs=[
                pl.BlockSpec((tile, N_IN), lambda i: (i, 0)),    # x tile (f32)
                full((N_IN, N_HID)),      full((1, N_HID)),      # l1
                full((N_HID, N_HID)),     full((1, N_HID)),      # l2
                full((N_HID, N_HID)),     full((1, N_HID)),      # l3
                full((N_HID, N_OUT_PAD)), full((1, N_OUT_PAD)),  # l4 (padded)
            ],
            out_specs=pl.BlockSpec((tile, N_OUT_PAD), lambda i: (i, 0)),
        ),
        compiler_params=pltpu.CompilerParams(
            dimension_semantics=("parallel",)),
        cost_estimate=cost,
    )(x2d, w1b, b1, w2b, b2, w3b, b3, w4p, b4p)

    return out[:B, :N_OUT]


def init_params(key):
    """Deterministic PyTorch-style init. Weights stored as (in, out) = W.T so the
    kernel computes x @ W_in_out + b (same math as torch's x @ W.T + b)."""
    ks = jax.random.split(key, 8)

    def linear(kw, kb, fan_in, fan_out):
        bound = 1.0 / jnp.sqrt(fan_in)
        w = jax.random.uniform(kw, (fan_in, fan_out), jnp.float32, -bound, bound)
        b = jax.random.uniform(kb, (1, fan_out), jnp.float32, -bound, bound)
        return w, b

    w1, b1 = linear(ks[0], ks[1], N_IN, N_HID)
    w2, b2 = linear(ks[2], ks[3], N_HID, N_HID)
    w3, b3 = linear(ks[4], ks[5], N_HID, N_HID)
    w4, b4 = linear(ks[6], ks[7], N_HID, N_OUT)
    return (w1, b1, w2, b2, w3, b3, w4, b4)


def mlp_reference(x, params):
    (w1, b1, w2, b2, w3, b3, w4, b4) = params
    h = x.reshape((-1, N_IN))
    h = jax.nn.sigmoid(h @ w1 + b1)
    h = jax.nn.sigmoid(h @ w2 + b2)
    h = jax.nn.sigmoid(h @ w3 + b3)
    return h @ w4 + b4


if __name__ == "__main__":
    key = jax.random.PRNGKey(0)
    k_params, k_x = jax.random.split(key)

    params = init_params(k_params)
    # Small deterministic NCHW input; batch deliberately NOT a multiple of 8 to
    # exercise the padding / remainder path.
    B = 13
    x = jax.random.normal(k_x, (B, 1, 28, 28), jnp.float32)

    out = jax.block_until_ready(mlp_forward(x, params))
    ref = mlp_reference(x, params)

    assert out.shape == (B, N_OUT)
    assert bool(jnp.all(jnp.isfinite(out)))
    # bf16 weights / in-kernel bf16 activations -> loosened tolerance vs f32 ref.
    assert jnp.allclose(out, ref, atol=2e-2, rtol=2e-2)

    print("KERNEL_OK")
</pallas_src>

<mosaic_0001>
module attributes {stable_mosaic.version = 11 : i64} {
  func.func @mlp_kernel(%arg0: i32, %arg1: memref<16x784xf32, #tpu.memory_space<vmem>>, %arg2: memref<784x20xbf16, #tpu.memory_space<vmem>>, %arg3: memref<1x20xf32, #tpu.memory_space<vmem>>, %arg4: memref<20x20xbf16, #tpu.memory_space<vmem>>, %arg5: memref<1x20xf32, #tpu.memory_space<vmem>>, %arg6: memref<20x20xbf16, #tpu.memory_space<vmem>>, %arg7: memref<1x20xf32, #tpu.memory_space<vmem>>, %arg8: memref<20x16xbf16, #tpu.memory_space<vmem>>, %arg9: memref<1x16xf32, #tpu.memory_space<vmem>>, %arg10: memref<16x16xf32, #tpu.memory_space<vmem>>) attributes {dimension_semantics = [#tpu.dimension_semantics<parallel>], iteration_bounds = array<i64: 1>, scalar_prefetch = 0 : i64, scratch_operands = 0 : i64, tpu.core_type = #tpu.core_type<tc>, window_params = [{transform_indices = @transform_0, window_bounds = array<i64: 16, 784>}, {pipeline_mode = #tpu.pipeline_mode<synchronous>, transform_indices = @transform_1, window_bounds = array<i64: 784, 20>}, {pipeline_mode = #tpu.pipeline_mode<synchronous>, transform_indices = @transform_2, window_bounds = array<i64: 1, 20>}, {pipeline_mode = #tpu.pipeline_mode<synchronous>, transform_indices = @transform_3, window_bounds = array<i64: 20, 20>}, {pipeline_mode = #tpu.pipeline_mode<synchronous>, transform_indices = @transform_4, window_bounds = array<i64: 1, 20>}, {pipeline_mode = #tpu.pipeline_mode<synchronous>, transform_indices = @transform_5, window_bounds = array<i64: 20, 20>}, {pipeline_mode = #tpu.pipeline_mode<synchronous>, transform_indices = @transform_6, window_bounds = array<i64: 1, 20>}, {pipeline_mode = #tpu.pipeline_mode<synchronous>, transform_indices = @transform_7, window_bounds = array<i64: 20, 16>}, {pipeline_mode = #tpu.pipeline_mode<synchronous>, transform_indices = @transform_8, window_bounds = array<i64: 1, 16>}, {transform_indices = @transform_9, window_bounds = array<i64: 16, 16>}]} {
    %c0 = arith.constant 0 : index
    %c0_0 = arith.constant 0 : index
    %0 = vector.load %arg1[%c0, %c0_0] : memref<16x784xf32, #tpu.memory_space<vmem>>, vector<16x784xf32>
    %1 = arith.truncf %0 : vector<16x784xf32> to vector<16x784xbf16>
    %c0_1 = arith.constant 0 : index
    %c0_2 = arith.constant 0 : index
    %2 = vector.load %arg2[%c0_1, %c0_2] : memref<784x20xbf16, #tpu.memory_space<vmem>>, vector<784x20xbf16>
    %cst = arith.constant dense<0.000000e+00> : vector<16x20xf32>
    %3 = tpu.matmul %1, %2, %cst {dimension_numbers = #tpu.dot_dimension_numbers<[1], [0], [0], [1], [0, 0, 1, 1], [], []>} : vector<16x784xbf16>, vector<784x20xbf16>, vector<16x20xf32> -> vector<16x20xf32>
    %c0_3 = arith.constant 0 : index
    %c0_4 = arith.constant 0 : index
    %4 = vector.load %arg3[%c0_3, %c0_4] : memref<1x20xf32, #tpu.memory_space<vmem>>, vector<1x20xf32>
    %5 = vector.broadcast %4 : vector<1x20xf32> to vector<16x20xf32>
    %6 = arith.addf %3, %5 : vector<16x20xf32>
    %7 = arith.negf %6 : vector<16x20xf32>
    %8 = math.exp %7 : vector<16x20xf32>
    %cst_5 = arith.constant 1.000000e+00 : f32
    %9 = vector.broadcast %cst_5 : f32 to vector<16x20xf32>
    %10 = arith.addf %9, %8 : vector<16x20xf32>
    %11 = arith.divf %9, %10 : vector<16x20xf32>
    %12 = arith.truncf %11 : vector<16x20xf32> to vector<16x20xbf16>
    %c0_6 = arith.constant 0 : index
    %c0_7 = arith.constant 0 : index
    %13 = vector.load %arg4[%c0_6, %c0_7] : memref<20x20xbf16, #tpu.memory_space<vmem>>, vector<20x20xbf16>
    %cst_8 = arith.constant dense<0.000000e+00> : vector<16x20xf32>
    %14 = tpu.matmul %12, %13, %cst_8 {dimension_numbers = #tpu.dot_dimension_numbers<[1], [0], [0], [1], [0, 0, 1, 1], [], []>} : vector<16x20xbf16>, vector<20x20xbf16>, vector<16x20xf32> -> vector<16x20xf32>
    %c0_9 = arith.constant 0 : index
    %c0_10 = arith.constant 0 : index
    %15 = vector.load %arg5[%c0_9, %c0_10] : memref<1x20xf32, #tpu.memory_space<vmem>>, vector<1x20xf32>
    %16 = vector.broadcast %15 : vector<1x20xf32> to vector<16x20xf32>
    %17 = arith.addf %14, %16 : vector<16x20xf32>
    %18 = arith.negf %17 : vector<16x20xf32>
    %19 = math.exp %18 : vector<16x20xf32>
    %cst_11 = arith.constant 1.000000e+00 : f32
    %20 = vector.broadcast %cst_11 : f32 to vector<16x20xf32>
    %21 = arith.addf %20, %19 : vector<16x20xf32>
    %22 = arith.divf %20, %21 : vector<16x20xf32>
    %23 = arith.truncf %22 : vector<16x20xf32> to vector<16x20xbf16>
    %c0_12 = arith.constant 0 : index
    %c0_13 = arith.constant 0 : index
    %24 = vector.load %arg6[%c0_12, %c0_13] : memref<20x20xbf16, #tpu.memory_space<vmem>>, vector<20x20xbf16>
    %cst_14 = arith.constant dense<0.000000e+00> : vector<16x20xf32>
    %25 = tpu.matmul %23, %24, %cst_14 {dimension_numbers = #tpu.dot_dimension_numbers<[1], [0], [0], [1], [0, 0, 1, 1], [], []>} : vector<16x20xbf16>, vector<20x20xbf16>, vector<16x20xf32> -> vector<16x20xf32>
    %c0_15 = arith.constant 0 : index
    %c0_16 = arith.constant 0 : index
    %26 = vector.load %arg7[%c0_15, %c0_16] : memref<1x20xf32, #tpu.memory_space<vmem>>, vector<1x20xf32>
    %27 = vector.broadcast %26 : vector<1x20xf32> to vector<16x20xf32>
    %28 = arith.addf %25, %27 : vector<16x20xf32>
    %29 = arith.negf %28 : vector<16x20xf32>
    %30 = math.exp %29 : vector<16x20xf32>
    %cst_17 = arith.constant 1.000000e+00 : f32
    %31 = vector.broadcast %cst_17 : f32 to vector<16x20xf32>
    %32 = arith.addf %31, %30 : vector<16x20xf32>
    %33 = arith.divf %31, %32 : vector<16x20xf32>
    %34 = arith.truncf %33 : vector<16x20xf32> to vector<16x20xbf16>
    %c0_18 = arith.constant 0 : index
    %c0_19 = arith.constant 0 : index
    %35 = vector.load %arg8[%c0_18, %c0_19] : memref<20x16xbf16, #tpu.memory_space<vmem>>, vector<20x16xbf16>
    %cst_20 = arith.constant dense<0.000000e+00> : vector<16x16xf32>
    %36 = tpu.matmul %34, %35, %cst_20 {dimension_numbers = #tpu.dot_dimension_numbers<[1], [0], [0], [1], [0, 0, 1, 1], [], []>} : vector<16x20xbf16>, vector<20x16xbf16>, vector<16x16xf32> -> vector<16x16xf32>
    %c0_21 = arith.constant 0 : index
    %c0_22 = arith.constant 0 : index
    %37 = vector.load %arg9[%c0_21, %c0_22] : memref<1x16xf32, #tpu.memory_space<vmem>>, vector<1x16xf32>
    %38 = vector.broadcast %37 : vector<1x16xf32> to vector<16x16xf32>
    %39 = arith.addf %36, %38 : vector<16x16xf32>
    %c0_23 = arith.constant 0 : index
    %c0_24 = arith.constant 0 : index
    %40 = vector.load %arg10[%c0_23, %c0_24] : memref<16x16xf32, #tpu.memory_space<vmem>>, vector<16x16xf32>
    tpu.vector_store %arg10[%c0_23, %c0_24], %39 {strides = array<i32>} : memref<16x16xf32, #tpu.memory_space<vmem>>, vector<16x16xf32>,
    return
  }
  func.func @transform_0(%arg0: i32) -> (i32, i32) {
    %c0_i32 = arith.constant 0 : i32
    %c0_i32_0 = arith.constant 0 : i32
    return %arg0, %c0_i32 : i32, i32
  }
  func.func @transform_1(%arg0: i32) -> (i32, i32) {
    %c0_i32 = arith.constant 0 : i32
    %c0_i32_0 = arith.constant 0 : i32
    %c0_i32_1 = arith.constant 0 : i32
    return %c0_i32, %c0_i32_0 : i32, i32
  }
  func.func @transform_2(%arg0: i32) -> (i32, i32) {
    %c0_i32 = arith.constant 0 : i32
    %c0_i32_0 = arith.constant 0 : i32
    %c0_i32_1 = arith.constant 0 : i32
    return %c0_i32, %c0_i32_0 : i32, i32
  }
  func.func @transform_3(%arg0: i32) -> (i32, i32) {
    %c0_i32 = arith.constant 0 : i32
    %c0_i32_0 = arith.constant 0 : i32
    %c0_i32_1 = arith.constant 0 : i32
    return %c0_i32, %c0_i32_0 : i32, i32
  }
  func.func @transform_4(%arg0: i32) -> (i32, i32) {
    %c0_i32 = arith.constant 0 : i32
    %c0_i32_0 = arith.constant 0 : i32
    %c0_i32_1 = arith.constant 0 : i32
    return %c0_i32, %c0_i32_0 : i32, i32
  }
  func.func @transform_5(%arg0: i32) -> (i32, i32) {
    %c0_i32 = arith.constant 0 : i32
    %c0_i32_0 = arith.constant 0 : i32
    %c0_i32_1 = arith.constant 0 : i32
    return %c0_i32, %c0_i32_0 : i32, i32
  }
  func.func @transform_6(%arg0: i32) -> (i32, i32) {
    %c0_i32 = arith.constant 0 : i32
    %c0_i32_0 = arith.constant 0 : i32
    %c0_i32_1 = arith.constant 0 : i32
    return %c0_i32, %c0_i32_0 : i32, i32
  }
  func.func @transform_7(%arg0: i32) -> (i32, i32) {
    %c0_i32 = arith.constant 0 : i32
    %c0_i32_0 = arith.constant 0 : i32
    %c0_i32_1 = arith.constant 0 : i32
    return %c0_i32, %c0_i32_0 : i32, i32
  }
  func.func @transform_8(%arg0: i32) -> (i32, i32) {
    %c0_i32 = arith.constant 0 : i32
    %c0_i32_0 = arith.constant 0 : i32
    %c0_i32_1 = arith.constant 0 : i32
    return %c0_i32, %c0_i32_0 : i32, i32
  }
  func.func @transform_9(%arg0: i32) -> (i32, i32) {
    %c0_i32 = arith.constant 0 : i32
    %c0_i32_0 = arith.constant 0 : i32
    return %arg0, %c0_i32 : i32, i32
  }
}

</mosaic_0001>

<bundles_post_ra>
// kernel: mlp_forward.1
= control target key start
LH: loop header
LB: loop body
LE: loop exit
PB: predicated region body
PF: predicated region fallthrough
CT: control target
= control target key end

     0   :  { %s1411_s0 = inlined_call_operand.vmem [shape: f32[16,784], index: 0, kind: input, shape index: {}]   ;;  %s1412_s1 = inlined_call_operand.vmem [shape: bf16[784,20], index: 1, kind: input, shape index: {}]   ;;  %s1413_s2 = inlined_call_operand.vmem [shape: f32[1,20], index: 2, kind: input, shape index: {}]   ;;  %s1414_s3 = inlined_call_operand.vmem [shape: bf16[20,20], index: 3, kind: input, shape index: {}]   ;;  %s1415_s4 = inlined_call_operand.vmem [shape: f32[1,20], index: 4, kind: input, shape index: {}]   ;;  %s1416_s5 = inlined_call_operand.vmem [shape: bf16[20,20], index: 5, kind: input, shape index: {}]   ;;  %s1417_s6 = inlined_call_operand.vmem [shape: f32[1,20], index: 6, kind: input, shape index: {}]   ;;  %s1418_s7 = inlined_call_operand.vmem [shape: bf16[20,16], index: 7, kind: input, shape index: {}]   ;;  %s1419_s8 = inlined_call_operand.vmem [shape: f32[1,16], index: 8, kind: input, shape index: {}]   ;;  %s1420_s9 = inlined_call_operand.hbm [shape: f32[16,16], index: 9, kind: output, shape index: {}]  }
   0x1   :  { %v1025_v0 = vld [vmem:[%s1412_s1 + $0x38] sm:$0xff]  ;;  %v1024_v4 = vld [vmem:[%s1412_s1 + $0x30] sm:$0xff]  ;;  %v1023_v8 = vld [vmem:[%s1412_s1 + $0x28] sm:$0xff] }
   0x2   :  { %v1033_v1 = vld [vmem:[%s1412_s1 + $0x78] sm:$0xff]  ;;  %455 = vmatpush.bf16.msra.mxu0 %v1025_v0  ;;  %v1032_v5 = vld [vmem:[%s1412_s1 + $0x70] sm:$0xff]  ;;  %v1031_v9 = vld [vmem:[%s1412_s1 + $0x68] sm:$0xff] }
   0x3   :  { %v1041_v2 = vld [vmem:[%s1412_s1 + $0xb8] sm:$0xff]  ;;  %469 = vmatpush.bf16.msra.mxu1 %v1033_v1  ;;  %v1040_v6 = vld [vmem:[%s1412_s1 + $0xb0] sm:$0xff]  ;;  %v1039_v10 = vld [vmem:[%s1412_s1 + $0xa8] sm:$0xff] }
   0x4   :  { %v1049_v3 = vld [vmem:[%s1412_s1 + $0xf8] sm:$0xff]  ;;  %483 = vmatpush.bf16.msra.mxu2 %v1041_v2  ;;  %v1048_v7 = vld [vmem:[%s1412_s1 + $0xf0] sm:$0xff]  ;;  %v1047_v11 = vld [vmem:[%s1412_s1 + $0xe8] sm:$0xff] }
   0x5   :  { %497 = vmatpush.bf16.msra.mxu3 %v1049_v3  ;;  %v1022_v12 = vld [vmem:[%s1412_s1 + $0x20] sm:$0xff]  ;;  %v1021_v16 = vld [vmem:[%s1412_s1 + $0x18] sm:$0xff]  ;;  %v1020_v20 = vld [vmem:[%s1412_s1 + $0x10] sm:$0xff] }
   0x6   :  { %456 = vmatpush.bf16.msra.mxu0 %v1024_v4  ;;  %v1030_v13 = vld [vmem:[%s1412_s1 + $0x60] sm:$0xff]  ;;  %v1029_v17 = vld [vmem:[%s1412_s1 + $0x58] sm:$0xff]  ;;  %v1028_v21 = vld [vmem:[%s1412_s1 + $0x50] sm:$0xff] }
   0x7   :  { %470 = vmatpush.bf16.msra.mxu1 %v1032_v5  ;;  %v1038_v14 = vld [vmem:[%s1412_s1 + $0xa0] sm:$0xff]  ;;  %v1037_v18 = vld [vmem:[%s1412_s1 + $0x98] sm:$0xff]  ;;  %v1036_v22 = vld [vmem:[%s1412_s1 + $0x90] sm:$0xff] }
   0x8   :  { %484 = vmatpush.bf16.msra.mxu2 %v1040_v6  ;;  %v1046_v15 = vld [vmem:[%s1412_s1 + $0xe0] sm:$0xff]  ;;  %v1045_v19 = vld [vmem:[%s1412_s1 + $0xd8] sm:$0xff]  ;;  %v1044_v23 = vld [vmem:[%s1412_s1 + $0xd0] sm:$0xff] }
   0x9   :  { %498 = vmatpush.bf16.msra.mxu3 %v1048_v7 }
   0xa   :  { %457 = vmatpush.bf16.msra.mxu0 %v1023_v8 }
   0xb   :  { %471 = vmatpush.bf16.msra.mxu1 %v1031_v9 }
   0xc   :  { %485 = vmatpush.bf16.msra.mxu2 %v1039_v10 }
   0xd   :  { %499 = vmatpush.bf16.msra.mxu3 %v1047_v11 }
   0xe   :  { %458 = vmatpush.bf16.msra.mxu0 %v1022_v12 }
   0xf   :  { %472 = vmatpush.bf16.msra.mxu1 %v1030_v13 }
  0x10   :  { %486 = vmatpush.bf16.msra.mxu2 %v1038_v14 }
  0x11   :  { %500 = vmatpush.bf16.msra.mxu3 %v1046_v15 }
  0x12   :  { %459 = vmatpush.bf16.msra.mxu0 %v1021_v16 }
  0x13   :  { %473 = vmatpush.bf16.msra.mxu1 %v1029_v17 }
  0x14   :  { %487 = vmatpush.bf16.msra.mxu2 %v1037_v18 }
  0x15   :  { %501 = vmatpush.bf16.msra.mxu3 %v1045_v19 }
  0x16   :  { %14 = vsyncpa [#allocation3], 0  ;;  %460 = vmatpush.bf16.msra.mxu0 %v1020_v20  ;;  %v1019_v24 = vld [vmem:[%s1412_s1 + $0x8] sm:$0xff]  ;;  %v1018_v28 = vld [vmem:[%s1412_s1] sm:$0xff]  ;;  %vm451_vm0 = vcmask 130048   ;;  %vm612_vm1 = vcmask 1041408  }
  0x17   :  { %474 = vmatpush.bf16.msra.mxu1 %v1028_v21  ;;  %v1027_v25 = vld [vmem:[%s1412_s1 + $0x48] sm:$0xff]  ;;  %v1026_v29 = vld [vmem:[%s1412_s1 + $0x40] sm:$0xff]  ;;  %v41_v31 = vld [vmem:[%s1411_s0 + $0x38] sm:$0xff]  ;;  %vm608_vm10 = vcmask 162816   ;;  %s1127_s21 = smov [#allocation2]   ;;  %s788_s25 = sshll.u32 %s1420_s9, 4  ;;  %s789_s25 = int_to_ptr.hbm [resolvable:$true] %s788_s25 }
  0x18   :  { %488 = vmatpush.bf16.msra.mxu2 %v1036_v22  ;;  %v1035_v26 = vld [vmem:[%s1412_s1 + $0x88] sm:$0xff]  ;;  %v34_v30 = vld [vmem:[%s1411_s0] sm:$0xff]  ;;  %v1057_v34 = vld [vmem:[%s1412_s1 + $0x138] sm:$0xff]  ;;  %s786_s22 = sshll.u32 %s1127_s21, 4  ;;  %s1128_s26 = smov 128   ;;  %s787_s22 = int_to_ptr.vmem [resolvable:$true] %s786_s22 }
  0x19   :  { %502 = vmatpush.bf16.msra.mxu3 %v1044_v23  ;;  %v1043_v27 = vld [vmem:[%s1412_s1 + $0xc8] sm:$0xff]  ;;  %v42_v33 = vld [vmem:[%s1411_s0 + $0x40] sm:$0xff]  ;;  %v1065_v35 = vld [vmem:[%s1412_s1 + $0x178] sm:$0xff]  ;;  %v48_v40 = vpack.c.bf16 %v41_v31, %v34_v30  ;;  %s1129_s27 = smov 8  }
  0x1a   :  { %461 = vmatpush.bf16.msra.mxu0 %v1019_v24  ;;  %v35_v32 = vld [vmem:[%s1411_s0 + $0x8] sm:$0xff]  ;;  %v1034_v36 = vld [vmem:[%s1412_s1 + $0x80] sm:$0xff]  ;;  %v36_v38 = vld [vmem:[%s1411_s0 + $0x10] sm:$0xff] }
  0x1b   :  { %475 = vmatpush.bf16.msra.mxu1 %v1027_v25  ;;  %v1042_v37 = vld [vmem:[%s1412_s1 + $0xc0] sm:$0xff]  ;;  %v43_v39 = vld [vmem:[%s1411_s0 + $0x48] sm:$0xff]  ;;  %v37_v41 = vld [vmem:[%s1411_s0 + $0x18] sm:$0xff]  ;;  %v49_v43 = vpack.c.bf16 %v42_v33, %v35_v32 }
  0x1c   :  { %489 = vmatpush.bf16.msra.mxu2 %v1035_v26  ;;  %v44_v42 = vld [vmem:[%s1411_s0 + $0x50] sm:$0xff]  ;;  %v1066_v44 = vld [vmem:[%s1412_s1 + $0x180] sm:$0xff]  ;;  %v50_v47 = vpack.c.bf16 %v43_v39, %v36_v38  ;;  %v1055_v49 = vld [vmem:[%s1412_s1 + $0x128] sm:$0xff] }
  0x1d   :  { %503 = vmatpush.bf16.msra.mxu3 %v1043_v27  ;;  %v1056_v45 = vld [vmem:[%s1412_s1 + $0x130] sm:$0xff]  ;;  %v51_v48 = vpack.c.bf16 %v44_v42, %v37_v41  ;;  %v1063_v50 = vld [vmem:[%s1412_s1 + $0x168] sm:$0xff]  ;;  %v1054_v51 = vld [vmem:[%s1412_s1 + $0x120] sm:$0xff] }
  0x1e   :  { %462 = vmatpush.bf16.msra.mxu0 %v1018_v28  ;;  %v1064_v46 = vld [vmem:[%s1412_s1 + $0x170] sm:$0xff]  ;;  %v1062_v52 = vld [vmem:[%s1412_s1 + $0x160] sm:$0xff]  ;;  %v1053_v53 = vld [vmem:[%s1412_s1 + $0x118] sm:$0xff] }
  0x1f   :  { %476 = vmatpush.bf16.msra.mxu1 %v1026_v29  ;;  %v1061_v54 = vld [vmem:[%s1412_s1 + $0x158] sm:$0xff]  ;;  %v40_v55 = vld [vmem:[%s1411_s0 + $0x30] sm:$0xff]  ;;  %v47_v56 = vld [vmem:[%s1411_s0 + $0x68] sm:$0xff] }
  0x20   :  { %490 = vmatpush.bf16.msra.mxu2 %v1034_v36  ;;  %v1052_v57 = vld [vmem:[%s1412_s1 + $0x110] sm:$0xff]  ;;  %v54_v59 = vpack.c.bf16 %v47_v56, %v40_v55  ;;  %v1051_v60 = vld [vmem:[%s1412_s1 + $0x108] sm:$0xff]  ;;  %v1050_v62 = vld [vmem:[%s1412_s1 + $0x100] sm:$0xff] }
  0x21   :  { %504 = vmatpush.bf16.msra.mxu3 %v1042_v37  ;;  %463 = vmatmul.bf16.vlgmr.msra.gmra.mxu0 %v48_v40  ;;  %v1060_v58 = vld [vmem:[%s1412_s1 + $0x150] sm:$0xff]  ;;  %v1059_v61 = vld [vmem:[%s1412_s1 + $0x148] sm:$0xff]  ;;  %v1058_v63 = vld [vmem:[%s1412_s1 + $0x140] sm:$0xff] }
  0x22   :  { %511 = vmatpush.bf16.msrb.mxu0 %v1057_v34  ;;  %477 = vmatmul.bf16.vlgmr.msra.gmra.mxu1 %v49_v43  ;;  %v38_v0 = vld [vmem:[%s1411_s0 + $0x20] sm:$0xff]  ;;  %v45_v1 = vld [vmem:[%s1411_s0 + $0x58] sm:$0xff]  ;;  %v39_v2 = vld [vmem:[%s1411_s0 + $0x28] sm:$0xff] }
  0x23   :  { %525 = vmatpush.bf16.msrb.mxu1 %v1065_v35  ;;  %491 = vmatmul.bf16.vlgmr.msra.gmra.mxu2 %v50_v47  ;;  %v46_v3 = vld [vmem:[%s1411_s0 + $0x60] sm:$0xff]  ;;  %v52_v4 = vpack.c.bf16 %v45_v1, %v38_v0  ;;  %v594_v22 = vld [vmem:[%s1414_s3 + $0x8] sm:$0x3] }
  0x24   :  { %546 = vmatpush.bf16.msrb.mxu2 %v1066_v44  ;;  %505 = vmatmul.bf16.vlgmr.msra.gmra.mxu3 %v51_v48  ;;  %v53_v5 = vpack.c.bf16 %v46_v3, %v39_v2  ;;  %v1073_v9 = vld [vmem:[%s1413_s2] ss:$0 sm:$0xff]  ;;  %v604_v24 = vunpack.c.l.b16 %v594_v22  ;;  %v671_v3 = vld [vmem:[%s1416_s5 + $0x8] sm:$0x3] }
  0x25   :  { %v1067_v32 = vld [vmem:[%s1414_s3] sm:$0xff] }
  0x26   :  { %512 = vmatpush.bf16.msrb.mxu0 %v1056_v45  ;;  %v606_v28 = vpack.c.b16 %v604_v24, %v604_v24 }
  0x27   :  { %526 = vmatpush.bf16.msrb.mxu1 %v1064_v46 }
  0x28   :  { %v614_v31 = vsel %vm612_vm1, %v606_v28, 0 }
  0x29   :  { %622 = vmatpush.bf16.msrb.mxu3 %v614_v31 }
  0x2a   :  { %513 = vmatpush.bf16.msrb.mxu0 %v1055_v49 }
  0x2b   :  { %527 = vmatpush.bf16.msrb.mxu1 %v1063_v50 }
  0x2d   :  { %623 = vmatpush.bf16.msrb.mxu3 %v1067_v32 }
  0x2e   :  { %514 = vmatpush.bf16.msrb.mxu0 %v1054_v51 }
  0x2f   :  { %528 = vmatpush.bf16.msrb.mxu1 %v1062_v52 }
  0x32   :  { %515 = vmatpush.bf16.msrb.mxu0 %v1053_v53 }
  0x33   :  { %529 = vmatpush.bf16.msrb.mxu1 %v1061_v54  ;;  %996 = vmatmul.msk.bf16.vlgmr.msrb.gmra.mxu2 %vm451_vm0, %v54_v59 }
  0x36   :  { %516 = vmatpush.bf16.msrb.mxu0 %v1052_v57 }
  0x37   :  { %530 = vmatpush.bf16.msrb.mxu1 %v1060_v58 }
  0x3a   :  { %517 = vmatpush.bf16.msrb.mxu0 %v1051_v60 }
  0x3b   :  { %531 = vmatpush.bf16.msrb.mxu1 %v1059_v61 }
  0x3e   :  { %518 = vmatpush.bf16.msrb.mxu0 %v1050_v62 }
  0x3f   :  { %532 = vmatpush.bf16.msrb.mxu1 %v1058_v63 }
  0x41   :  { %519 = vmatmul.bf16.vlgmr.msrb.gmra.mxu0 %v52_v4  ;;  %v1074_v4 = vld [vmem:[%s1415_s4] ss:$0 sm:$0xff] }
  0x42   :  { %533 = vmatmul.bf16.vlgmr.msrb.gmra.mxu1 %v53_v5  ;;  %v681_v5 = vunpack.c.l.b16 %v671_v3 }
  0x9e   :  { %v464_v6 = vpop.f32.mrf.mxu0 }
  0x9f   :  { %v478_v7 = vpop.f32.mrf.mxu1  ;;  %v465_v10 = vadd.f32 %v1073_v9, %v464_v6  ;;  %v683_v6 = vpack.c.b16 %v681_v5, %v681_v5 }
  0xa1   :  { %v479_v11 = vadd.f32 %v478_v7, %v465_v10  ;;  %v1068_v10 = vld [vmem:[%s1416_s5] sm:$0xff] }
  0xa6   :  { %v492_v8 = vpop.f32.mrf.mxu2  ;;  %v466_v12 = vpop.f32.mrf.mxu0 }
  0xa7   :  { %v480_v13 = vpop.f32.mrf.mxu1  ;;  %v506_v15 = vpop.f32.mrf.mxu3  ;;  %v493_v16 = vadd.f32 %v492_v8, %v479_v11  ;;  %v467_v17 = vadd.f32 %v1073_v9, %v466_v12  ;;  %v689_v9 = vsel %vm612_vm1, %v683_v6, 0 }
  0xa8   :  { %697 = vmatpush.bf16.msra.mxu2 %v689_v9 }
  0xa9   :  { %v507_v18 = vadd.f32 %v506_v15, %v493_v16  ;;  %v481_v19 = vadd.f32 %v480_v13, %v467_v17 }
  0xac   :  { %698 = vmatpush.bf16.msra.mxu2 %v1068_v10 }
  0xae   :  { %v494_v14 = vpop.f32.mrf.mxu2 }
  0xaf   :  { %v495_v26 = vadd.f32 %v494_v14, %v481_v19  ;;  %v508_v29 = vpop.f32.mrf.mxu3 }
  0xb1   :  { %v509_v33 = vadd.f32 %v508_v29, %v495_v26 }
  0xb6   :  { %v548_v25 = vpop.f32.mrf.mxu2 }
  0xbe   :  { %v520_v20 = vpop.f32.mrf.mxu0  ;;  %v550_v39 = vpop.f32.mrf.mxu2 }
  0xbf   :  { %v534_v21 = vpop.f32.mrf.mxu1  ;;  %v521_v23 = vadd.f32 %v520_v20, %v507_v18 }
  0xc1   :  { %v535_v27 = vadd.f32 %v534_v21, %v521_v23 }
  0xc3   :  { %v549_v30 = vadd.f32 %v548_v25, %v535_v27 }
  0xc5   :  { %v997_v34 = vmul.f32 -1.442695, %v549_v30 }
  0xc6   :  { %v522_v35 = vpop.f32.mrf.mxu0 }
  0xc7   :  { %1077 = vpow2.f32 %v997_v34  ;;  %v523_v36 = vadd.f32 %v522_v35, %v509_v33  ;;  %v536_v37 = vpop.f32.mrf.mxu1 }
  0xc9   :  { %v537_v38 = vadd.f32 %v536_v37, %v523_v36 }
  0xcb   :  { %v551_v40 = vadd.f32 %v550_v39, %v537_v38 }
  0xcd   :  { %v1078_v41 = vpop.eup %1077  ;;  %v998_v42 = vmul.f32 -1.442695, %v551_v40  ;;  %v746_v40 = vld [vmem:[%s1418_s7 + $0x8] sm:$0x3] }
  0xce   :  { %v559_v43 = vadd.f32 1.0, %v1078_v41  ;;  %v1075_v41 = vld [vmem:[%s1417_s6] ss:$0 sm:$0xff] }
  0xcf   :  { %1079 = vpow2.f32 %v998_v42  ;;  %v756_v42 = vunpack.c.l.b16 %v746_v40 }
  0xd0   :  { %1081 = vrcp.f32 %v559_v43  ;;  %vm566_vm3 = vweird.f32 %v559_v43  ;;  %v572_v54 = vand.u32 2147483648, %v559_v43  ;;  %v570_v56 = vand.u32 2147483647, %v559_v43 }
  0xd2   :  { %v573_v61 = vor.u32 1.1754944e-38, %v572_v54  ;;  %vm571_vm8 = vcmp.eq.f32.partialorder %v570_v56, 8.507059e+37 }
  0xd5   :  { %v1080_v44 = vpop.eup %1079 }
  0xd6   :  { %v1082_v45 = vpop.eup %1081  ;;  %v560_v46 = vadd.f32 1.0, %v1080_v44 }
  0xd7   :  { %v562_v47 = vmul.f32 %v1082_v45, %v559_v43  ;;  %vm567_vm2 = vweird.f32 %v1082_v45  ;;  %v758_v43 = vpack.c.b16 %v756_v42, %v756_v42 }
  0xd8   :  { %1083 = vrcp.f32 %v560_v46  ;;  %v587_v55 = vand.u32 2147483648, %v560_v46  ;;  %v585_v58 = vand.u32 2147483647, %v560_v46  ;;  %vm568_vm5 = vmor %vm566_vm3, %vm567_vm2  ;;  %vm581_vm6 = vweird.f32 %v560_v46 }
  0xd9   :  { %v563_v48 = vsub.f32 1.0, %v562_v47  ;;  %v1069_v47 = vld [vmem:[%s1418_s7] sm:$0xff] }
  0xda   :  { %v588_v62 = vor.u32 1.1754944e-38, %v587_v55  ;;  %vm586_vm9 = vcmp.eq.f32.partialorder %v585_v58, 8.507059e+37 }
  0xdb   :  { %v564_v49 = vmul.f32 %v1082_v45, %v563_v48 }
  0xdd   :  { %v565_v53 = vadd.f32 %v1082_v45, %v564_v49 }
  0xde   :  { %v1084_v50 = vpop.eup %1083 }
  0xdf   :  { %v577_v51 = vmul.f32 %v1084_v50, %v560_v46  ;;  %vm582_vm4 = vweird.f32 %v1084_v50  ;;  %v569_v59 = vsel %vm568_vm5, %v1082_v45, %v565_v53  ;;  %v764_v46 = vsel %vm612_vm1, %v758_v43, 0 }
  0xe0   :  { %vm583_vm7 = vmor %vm581_vm6, %vm582_vm4  ;;  %v574_v0 = vsel %vm571_vm8, %v573_v61, %v569_v59  ;;  %772 = vmatpush.bf16.msra.mxu3 %v764_v46 }
  0xe1   :  { %v578_v52 = vsub.f32 1.0, %v577_v51 }
  0xe3   :  { %v579_v57 = vmul.f32 %v1084_v50, %v578_v52 }
  0xe4   :  { %773 = vmatpush.bf16.msra.mxu3 %v1069_v47 }
  0xe5   :  { %v580_v60 = vadd.f32 %v1084_v50, %v579_v57 }
  0xe7   :  { %v584_v63 = vsel %vm583_vm7, %v1084_v50, %v580_v60 }
  0xe8   :  { %v589_v1 = vsel %vm586_vm9, %v588_v62, %v584_v63 }
  0xe9   :  { %v591_v2 = vpack.c.bf16 %v589_v1, %v574_v0 }
  0xeb   :  { %1003 = vmatmul.msk.bf16.vlgmr.msrb.gmra.mxu3 %vm608_vm10, %v591_v2 }
 0x16e   :  { %v625_v7 = vpop.f32.mrf.mxu3 }
 0x16f   :  { %v626_v8 = vadd.f32 %v1074_v4, %v625_v7 }
 0x171   :  { %v1004_v11 = vmul.f32 -1.442695, %v626_v8 }
 0x173   :  { %1085 = vpow2.f32 %v1004_v11 }
 0x176   :  { %v627_v12 = vpop.f32.mrf.mxu3 }
 0x177   :  { %v628_v13 = vadd.f32 %v1074_v4, %v627_v12 }
 0x179   :  { %v1086_v14 = vpop.eup %1085  ;;  %v1005_v15 = vmul.f32 -1.442695, %v628_v13  ;;  %v1076_v13 = vld [vmem:[%s1419_s8] ss:$0 sm:$0xff] }
 0x17a   :  { %v636_v16 = vadd.f32 1.0, %v1086_v14 }
 0x17b   :  { %1087 = vpow2.f32 %v1005_v15 }
 0x17c   :  { %1089 = vrcp.f32 %v636_v16  ;;  %vm643_vm12 = vweird.f32 %v636_v16  ;;  %v649_v27 = vand.u32 2147483648, %v636_v16  ;;  %v647_v30 = vand.u32 2147483647, %v636_v16 }
 0x17e   :  { %v650_v34 = vor.u32 1.1754944e-38, %v649_v27  ;;  %vm648_vm3 = vcmp.eq.f32.partialorder %v647_v30, 8.507059e+37 }
 0x181   :  { %v1088_v17 = vpop.eup %1087 }
 0x182   :  { %v1090_v18 = vpop.eup %1089  ;;  %v637_v19 = vadd.f32 1.0, %v1088_v17 }
 0x183   :  { %v639_v20 = vmul.f32 %v1090_v18, %v636_v16  ;;  %vm644_vm11 = vweird.f32 %v1090_v18 }
 0x184   :  { %1091 = vrcp.f32 %v637_v19  ;;  %v664_v28 = vand.u32 2147483648, %v637_v19  ;;  %v662_v31 = vand.u32 2147483647, %v637_v19  ;;  %vm645_vm14 = vmor %vm643_vm12, %vm644_vm11  ;;  %vm658_vm15 = vweird.f32 %v637_v19 }
 0x185   :  { %v640_v21 = vsub.f32 1.0, %v639_v20 }
 0x186   :  { %v665_v35 = vor.u32 1.1754944e-38, %v664_v28  ;;  %vm663_vm4 = vcmp.eq.f32.partialorder %v662_v31, 8.507059e+37 }
 0x187   :  { %v641_v22 = vmul.f32 %v1090_v18, %v640_v21 }
 0x189   :  { %v642_v26 = vadd.f32 %v1090_v18, %v641_v22 }
 0x18a   :  { %v1092_v23 = vpop.eup %1091 }
 0x18b   :  { %v654_v24 = vmul.f32 %v1092_v23, %v637_v19  ;;  %vm659_vm13 = vweird.f32 %v1092_v23  ;;  %v646_v32 = vsel %vm645_vm14, %v1090_v18, %v642_v26 }
 0x18c   :  { %vm660_vm2 = vmor %vm658_vm15, %vm659_vm13  ;;  %v651_v37 = vsel %vm648_vm3, %v650_v34, %v646_v32 }
 0x18d   :  { %v655_v25 = vsub.f32 1.0, %v654_v24 }
 0x18f   :  { %v656_v29 = vmul.f32 %v1092_v23, %v655_v25 }
 0x191   :  { %v657_v33 = vadd.f32 %v1092_v23, %v656_v29 }
 0x193   :  { %v661_v36 = vsel %vm660_vm2, %v1092_v23, %v657_v33 }
 0x194   :  { %v666_v38 = vsel %vm663_vm4, %v665_v35, %v661_v36 }
 0x195   :  { %v668_v39 = vpack.c.bf16 %v666_v38, %v651_v37 }
 0x197   :  { %1010 = vmatmul.msk.bf16.vlgmr.msra.gmra.mxu2 %vm608_vm10, %v668_v39 }
 0x21a   :  { %v700_v44 = vpop.f32.mrf.mxu2 }
 0x21b   :  { %v701_v45 = vadd.f32 %v1075_v41, %v700_v44 }
 0x21d   :  { %v1011_v48 = vmul.f32 -1.442695, %v701_v45 }
 0x21f   :  { %1093 = vpow2.f32 %v1011_v48 }
 0x222   :  { %v702_v49 = vpop.f32.mrf.mxu2 }
 0x223   :  { %v703_v50 = vadd.f32 %v1075_v41, %v702_v49 }
 0x225   :  { %v1094_v51 = vpop.eup %1093  ;;  %v1012_v52 = vmul.f32 -1.442695, %v703_v50 }
 0x226   :  { %v711_v53 = vadd.f32 1.0, %v1094_v51 }
 0x227   :  { %1095 = vpow2.f32 %v1012_v52 }
 0x228   :  { %1097 = vrcp.f32 %v711_v53  ;;  %vm718_vm5 = vweird.f32 %v711_v53  ;;  %v724_v0 = vand.u32 2147483648, %v711_v53  ;;  %v722_v3 = vand.u32 2147483647, %v711_v53 }
 0x22a   :  { %v725_v7 = vor.u32 1.1754944e-38, %v724_v0  ;;  %vm723_vm11 = vcmp.eq.f32.partialorder %v722_v3, 8.507059e+37 }
 0x22d   :  { %v1096_v54 = vpop.eup %1095 }
 0x22e   :  { %v1098_v55 = vpop.eup %1097  ;;  %v712_v56 = vadd.f32 1.0, %v1096_v54 }
 0x22f   :  { %v714_v57 = vmul.f32 %v1098_v55, %v711_v53  ;;  %vm719_vm1 = vweird.f32 %v1098_v55 }
 0x230   :  { %1099 = vrcp.f32 %v712_v56  ;;  %v739_v1 = vand.u32 2147483648, %v712_v56  ;;  %v737_v4 = vand.u32 2147483647, %v712_v56  ;;  %vm720_vm7 = vmor %vm718_vm5, %vm719_vm1  ;;  %vm733_vm8 = vweird.f32 %v712_v56 }
 0x231   :  { %v715_v58 = vsub.f32 1.0, %v714_v57 }
 0x232   :  { %v740_v8 = vor.u32 1.1754944e-38, %v739_v1  ;;  %vm738_vm12 = vcmp.eq.f32.partialorder %v737_v4, 8.507059e+37 }
 0x233   :  { %v716_v59 = vmul.f32 %v1098_v55, %v715_v58 }
 0x235   :  { %v717_v63 = vadd.f32 %v1098_v55, %v716_v59 }
 0x236   :  { %v1100_v60 = vpop.eup %1099 }
 0x237   :  { %v729_v61 = vmul.f32 %v1100_v60, %v712_v56  ;;  %vm734_vm6 = vweird.f32 %v1100_v60  ;;  %v721_v5 = vsel %vm720_vm7, %v1098_v55, %v717_v63 }
 0x238   :  { %vm735_vm9 = vmor %vm733_vm8, %vm734_vm6  ;;  %v726_v10 = vsel %vm723_vm11, %v725_v7, %v721_v5 }
 0x239   :  { %v730_v62 = vsub.f32 1.0, %v729_v61 }
 0x23b   :  { %v731_v2 = vmul.f32 %v1100_v60, %v730_v62 }
 0x23d   :  { %v732_v6 = vadd.f32 %v1100_v60, %v731_v2 }
 0x23f   :  { %v736_v9 = vsel %vm735_vm9, %v1100_v60, %v732_v6 }
 0x240   :  { %v741_v11 = vsel %vm738_vm12, %v740_v8, %v736_v9 }
 0x241   :  { %v743_v12 = vpack.c.bf16 %v741_v11, %v726_v10 }
 0x243   :  { %1017 = vmatmul.msk.bf16.vlgmr.msra.gmra.mxu3 %vm608_vm10, %v743_v12 }
 0x2c6   :  { %v775_v14 = vpop.f32.mrf.mxu3 }
 0x2c7   :  { %v776_v15 = vadd.f32 %v1076_v13, %v775_v14 }
 0x2c9   :  { %780 = vst.msk [vmem:[#allocation2] sm:$0xff] %vm451_vm0, %v776_v15 }
 0x2ce   :  { %v777_v16 = vpop.f32.mrf.mxu3 }
 0x2cf   :  { %v778_v17 = vadd.f32 %v1076_v13, %v777_v16 }
 0x2d1   :  { %781 = vst.msk [vmem:[#allocation2 + $0x8] sm:$0xff] %vm451_vm0, %v778_v17 }
 0x2d2   :  { %794 = dma.vmem_to_hbm [thread:$0]  %s787_s22, 256, %s789_s25, [#allocation3], %s1128_s26, %s1128_s26, %s1129_s27  }
 0x2d3   :  { %1125 = dma.done.wait [#allocation3], 256  }
 0x2d4   :  { %1126 = vsyncadd [#allocation3], 4294967040 }
 0x2d5   :  { %799 = vsyncpa [#allocation3], 1 }

</bundles_post_ra>
